<compile_context>
chip_gen: v5e
topology: v5e:2x2
jax: 0.10.0
libtpu: 0.0.40
codegen_flags: <defaults>
</compile_context>

<pallas_src>
import functools
import math

import jax
import jax.numpy as jnp
from jax.experimental import pallas as pl
from jax.experimental.pallas import tpu as pltpu


# --------------------------------------------------------------------------- #
# Kernel
# --------------------------------------------------------------------------- #
def attention_layer_kernel(q_ref, k_ref, v_ref,
                           wq_ref, bq_ref, wkv_ref, bkv_ref,
                           o_ref, *, mxu_dtype=None):
    # q_ref:   (Bt, d_model)
    # k_ref:   (Bt, S, kc)          v_ref: (Bt, S, kc)
    # wq_ref:  (d_model, out)       bq_ref:  (1, out)       (f32)
    # wkv_ref: (2*kc, 2*out) block-diag [[Wk,0],[0,Wv]]     (f32)
    # bkv_ref: (1, 2*out) = [bk | bv]                       (f32)
    # o_ref:   (Bt, S*out)  lane-dense flattened output block
    Bt, S, kc = k_ref.shape
    out_ch = wq_ref.shape[1]

    def mm(a, b):
        # In-kernel cast of MXU operands only (free VPU slots); f32 accumulation.
        if mxu_dtype is not None:
            a = a.astype(mxu_dtype)
            b = b.astype(mxu_dtype)
        return jnp.dot(a, b, preferred_element_type=jnp.float32)

    # ---- Q projection (MXU), bias add in f32 ----
    q = mm(q_ref[...], wq_ref[...]) + bq_ref[...]                     # (Bt, out)

    # ---- Fused K|V projection: one (Bt*S, 2kc) @ (2kc, 2out) matmul ----
    kv_in = jnp.concatenate([k_ref[...], v_ref[...]], axis=-1)        # (Bt, S, 2kc)
    kv_in = kv_in.reshape(Bt * S, 2 * kc)                             # leading-dim collapse
    kv = mm(kv_in, wkv_ref[...]) + bkv_ref[...]                       # (Bt*S, 2*out)
    kv = kv.reshape(Bt, S, 2 * out_ch)
    k = kv[..., :out_ch]                                              # (Bt, S, out)
    v = kv[..., out_ch:]                                              # (Bt, S, out)

    # ---- Single-row scaled dot-product attention (VPU mul + XLU reduce) ----
    # Every one of the S output rows per batch element is identical, so only one
    # score row / one attended row is computed per batch element.
    scale = 1.0 / math.sqrt(float(out_ch))
    scores = jnp.sum(q[:, None, :] * k, axis=-1) * scale              # (Bt, S)

    m = jnp.max(scores, axis=-1, keepdims=True)                       # (Bt, 1)
    e = jnp.exp(scores - m)                                           # (Bt, S)
    denom = jnp.sum(e, axis=-1, keepdims=True)                        # (Bt, 1)
    r = pl.reciprocal(denom, approx=True)                             # EUP slot
    r = r * (2.0 - denom * r)                                         # Newton step -> ~f32
    attn = e * r                                                      # (Bt, S)

    attended = jnp.sum(attn[:, :, None] * v, axis=1)                  # (Bt, out)

    # ---- Lane-dense broadcast store: one tile/broadcast, not S-1 concats ----
    flat = jnp.broadcast_to(attended[:, None, :],
                            (Bt, S, out_ch)).reshape(Bt, S * out_ch)  # (Bt, S*out)
    o_ref[...] = flat.astype(o_ref.dtype)


# --------------------------------------------------------------------------- #
# Wrapper
# --------------------------------------------------------------------------- #
def _vmem_budget_bytes():
    """Generation-aware VMEM budget for input/output blocks + intermediates."""
    try:
        cap = pltpu.get_tpu_info().vmem_capacity_bytes
        # 128 MiB (v5e/v6e) -> 12 MiB ; 64 MiB (v7x) -> 8 MiB.  Stays under the
        # default scoped VMEM limit on every generation (no vmem_limit_bytes
        # override needed).
        return max(4 << 20, min(cap // 8, 12 << 20))
    except Exception:
        return 8 << 20


def _per_elem_vmem_bytes(S, d_model, k_channels, out_ch):
    """Rough f32 VMEM bytes per batch element (double-buffered blocks + live)."""
    blocks = 4 * (d_model + 2 * S * k_channels + S * out_ch)      # q/k/v/out blocks
    interm = 4 * (S * 2 * k_channels                              # kv concat
                  + 2 * S * out_ch                                # k,v projected
                  + 2 * S + 2 * out_ch                            # scores/attn/q/att
                  + S * out_ch)                                   # flat store value
    return 2 * blocks + interm


def _largest_divisor_leq(n, cap):
    for d in range(min(cap, n), 0, -1):
        if n % d == 0:
            return d
    return 1


def attention_layer(query, key, value, params, *, block_b=None, mxu_dtype=None):
    """query: (B, d_model); key/value: (B, S, k_channels) -> (B, S, out_channels)."""
    B, d_model = query.shape
    _, S, k_channels = key.shape
    wq, bq, wk, bk, wv, bv = params
    out_ch = wq.shape[1]

    # ---- block_b selection: few, large grid steps; no padding by default ----
    per_elem = _per_elem_vmem_bytes(S, d_model, k_channels, out_ch)
    cap = max(1, min(2048, _vmem_budget_bytes() // per_elem))
    if block_b is None:
        if B <= cap:
            # Split across the two v7x TensorCores only when each half is a
            # worthwhile step; tiny batches run as a single grid step.
            if B >= 256 and B % 2 == 0:
                block_b = B // 2
            else:
                block_b = B
        else:
            block_b = _largest_divisor_leq(B, cap)

    if B % block_b == 0:
        grid_b = B // block_b
        B_pad = B
        q_in, k_in, v_in = query, key, value
    else:
        # Fallback only for an explicitly requested non-dividing block_b.
        grid_b = pl.cdiv(B, block_b)
        B_pad = grid_b * block_b
        pad = B_pad - B
        q_in = jnp.pad(query, ((0, pad), (0, 0)))
        k_in = jnp.pad(key, ((0, pad), (0, 0), (0, 0)))
        v_in = jnp.pad(value, ((0, pad), (0, 0), (0, 0)))

    # ---- Small weight prep (tiny tensors; done once per call) ----
    bq2 = bq.reshape(1, out_ch).astype(jnp.float32)
    # Block-diagonal fused K/V weight: [key | value] @ [[Wk, 0], [0, Wv]].
    wkv = jnp.zeros((2 * k_channels, 2 * out_ch), jnp.float32)
    wkv = wkv.at[:k_channels, :out_ch].set(wq.dtype.type(0) + wk.astype(jnp.float32))
    wkv = wkv.at[k_channels:, out_ch:].set(wv.astype(jnp.float32))
    bkv = jnp.concatenate([bk, bv]).reshape(1, 2 * out_ch).astype(jnp.float32)

    const2d = lambda b: (0, 0)
    kernel = functools.partial(attention_layer_kernel, mxu_dtype=mxu_dtype)

    out_flat = pl.pallas_call(
        kernel,
        out_shape=jax.ShapeDtypeStruct((B_pad, S * out_ch), jnp.float32),
        grid_spec=pltpu.PrefetchScalarGridSpec(
            num_scalar_prefetch=0,
            grid=(grid_b,),
            in_specs=[
                pl.BlockSpec((block_b, d_model), lambda b: (b, 0)),           # query
                pl.BlockSpec((block_b, S, k_channels), lambda b: (b, 0, 0)),  # key
                pl.BlockSpec((block_b, S, k_channels), lambda b: (b, 0, 0)),  # value
                pl.BlockSpec((d_model, out_ch), const2d),                     # Wq
                pl.BlockSpec((1, out_ch), const2d),                           # bq
                pl.BlockSpec((2 * k_channels, 2 * out_ch), const2d),          # Wkv (blockdiag)
                pl.BlockSpec((1, 2 * out_ch), const2d),                       # bkv
            ],
            out_specs=pl.BlockSpec((block_b, S * out_ch), lambda b: (b, 0)),
        ),
        compiler_params=pltpu.CompilerParams(
            dimension_semantics=("parallel",)),
    )(q_in, k_in, v_in, wq.astype(jnp.float32), bq2, wkv, bkv)

    return out_flat.reshape(B_pad, S, out_ch)[:B]


# --------------------------------------------------------------------------- #
# Pure-JAX reference (mirrors the PyTorch module)
# --------------------------------------------------------------------------- #
def reference(query, key, value, params):
    wq, bq, wk, bk, wv, bv = params
    B, S, _ = key.shape
    q = query @ wq + bq                                    # (B, out)
    q = jnp.broadcast_to(q[:, None, :], (B, S, q.shape[-1]))
    k = key @ wk + bk
    v = value @ wv + bv
    scale = 1.0 / jnp.sqrt(jnp.float32(q.shape[-1]))
    scores = jnp.einsum('bqd,bkd->bqk', q, k) * scale
    attn = jax.nn.softmax(scores, axis=-1)
    return jnp.einsum('bqk,bkd->bqd', attn, v)


if __name__ == "__main__":
    B, S = 2, 8
    d_model, k_channels, out_channels = 32, 16, 32

    key0 = jax.random.PRNGKey(0)
    ks = jax.random.split(key0, 9)

    def init_linear(kw, kb, fan_in, fan_out):
        bound = 1.0 / math.sqrt(fan_in)
        w = jax.random.uniform(kw, (fan_in, fan_out), jnp.float32, -bound, bound)
        b = jax.random.uniform(kb, (fan_out,), jnp.float32, -bound, bound)
        return w, b

    wq, bq = init_linear(ks[0], ks[1], d_model, out_channels)
    wk, bk = init_linear(ks[2], ks[3], k_channels, out_channels)
    wv, bv = init_linear(ks[4], ks[5], k_channels, out_channels)
    params = (wq, bq, wk, bk, wv, bv)

    query = jax.random.normal(ks[6], (B, d_model), jnp.float32)
    key_in = jax.random.normal(ks[7], (B, S, k_channels), jnp.float32)
    value_in = jax.random.normal(ks[8], (B, S, k_channels), jnp.float32)

    ref = reference(query, key_in, value_in, params)

    # f32 path (default; B=2 -> single grid step, block_b=B, no padding).
    out = attention_layer(query, key_in, value_in, params)
    out = jax.block_until_ready(out)
    assert out.shape == (B, S, out_channels)
    assert jnp.allclose(out, ref, atol=1e-4, rtol=1e-4), "f32 mismatch vs reference"

    # In-kernel bf16 MXU-operand path (softmax / bias / accumulation stay f32).
    out_bf16 = attention_layer(query, key_in, value_in, params,
                               mxu_dtype=jnp.bfloat16)
    out_bf16 = jax.block_until_ready(out_bf16)
    assert jnp.allclose(out_bf16, ref, atol=5e-2, rtol=5e-2), "bf16 mismatch vs reference"

    # Larger batch: exercises the two-step (per-TensorCore) tiling path.
    B2 = 256
    kq, kk, kv_ = jax.random.split(jax.random.PRNGKey(1), 3)
    query2 = jax.random.normal(kq, (B2, d_model), jnp.float32)
    key2 = jax.random.normal(kk, (B2, S, k_channels), jnp.float32)
    value2 = jax.random.normal(kv_, (B2, S, k_channels), jnp.float32)
    out2 = jax.block_until_ready(attention_layer(query2, key2, value2, params))
    ref2 = reference(query2, key2, value2, params)
    assert jnp.allclose(out2, ref2, atol=1e-4, rtol=1e-4), "large-B mismatch vs reference"

    print("KERNEL_OK")
</pallas_src>

<mosaic_0001>
module attributes {stable_mosaic.version = 11 : i64} {
  func.func @attention_layer_kernel(%arg0: i32, %arg1: memref<2x32xf32, #tpu.memory_space<vmem>>, %arg2: memref<2x8x16xf32, #tpu.memory_space<vmem>>, %arg3: memref<2x8x16xf32, #tpu.memory_space<vmem>>, %arg4: memref<32x32xf32, #tpu.memory_space<vmem>>, %arg5: memref<1x32xf32, #tpu.memory_space<vmem>>, %arg6: memref<32x64xf32, #tpu.memory_space<vmem>>, %arg7: memref<1x64xf32, #tpu.memory_space<vmem>>, %arg8: memref<2x256xf32, #tpu.memory_space<vmem>>) attributes {dimension_semantics = [#tpu.dimension_semantics<parallel>], iteration_bounds = array<i64: 1>, scalar_prefetch = 0 : i64, scratch_operands = 0 : i64, tpu.core_type = #tpu.core_type<tc>, window_params = [{transform_indices = @transform_0, window_bounds = array<i64: 2, 32>}, {transform_indices = @transform_1, window_bounds = array<i64: 2, 8, 16>}, {transform_indices = @transform_2, window_bounds = array<i64: 2, 8, 16>}, {pipeline_mode = #tpu.pipeline_mode<synchronous>, transform_indices = @transform_3, window_bounds = array<i64: 32, 32>}, {pipeline_mode = #tpu.pipeline_mode<synchronous>, transform_indices = @transform_4, window_bounds = array<i64: 1, 32>}, {pipeline_mode = #tpu.pipeline_mode<synchronous>, transform_indices = @transform_5, window_bounds = array<i64: 32, 64>}, {pipeline_mode = #tpu.pipeline_mode<synchronous>, transform_indices = @transform_6, window_bounds = array<i64: 1, 64>}, {transform_indices = @transform_7, window_bounds = array<i64: 2, 256>}]} {
    %c0 = arith.constant 0 : index
    %c0_0 = arith.constant 0 : index
    %0 = vector.load %arg1[%c0, %c0_0] : memref<2x32xf32, #tpu.memory_space<vmem>>, vector<2x32xf32>
    %c0_1 = arith.constant 0 : index
    %c0_2 = arith.constant 0 : index
    %1 = vector.load %arg4[%c0_1, %c0_2] : memref<32x32xf32, #tpu.memory_space<vmem>>, vector<32x32xf32>
    %cst = arith.constant dense<0.000000e+00> : vector<2x32xf32>
    %2 = tpu.matmul %0, %1, %cst {dimension_numbers = #tpu.dot_dimension_numbers<[1], [0], [0], [1], [0, 0, 1, 1], [], []>} : vector<2x32xf32>, vector<32x32xf32>, vector<2x32xf32> -> vector<2x32xf32>
    %c0_3 = arith.constant 0 : index
    %c0_4 = arith.constant 0 : index
    %3 = vector.load %arg5[%c0_3, %c0_4] : memref<1x32xf32, #tpu.memory_space<vmem>>, vector<1x32xf32>
    %4 = vector.broadcast %3 : vector<1x32xf32> to vector<2x32xf32>
    %5 = arith.addf %2, %4 : vector<2x32xf32>
    %c0_5 = arith.constant 0 : index
    %c0_6 = arith.constant 0 : index
    %c0_7 = arith.constant 0 : index
    %6 = vector.load %arg2[%c0_5, %c0_6, %c0_7] : memref<2x8x16xf32, #tpu.memory_space<vmem>>, vector<2x8x16xf32>
    %c0_8 = arith.constant 0 : index
    %c0_9 = arith.constant 0 : index
    %c0_10 = arith.constant 0 : index
    %7 = vector.load %arg3[%c0_8, %c0_9, %c0_10] : memref<2x8x16xf32, #tpu.memory_space<vmem>>, vector<2x8x16xf32>
    %8 = tpu.concatenate %6, %7 in 2 : vector<2x8x16xf32>, vector<2x8x16xf32> -> vector<2x8x32xf32>
    %9 = vector.shape_cast %8 : vector<2x8x32xf32> to vector<16x32xf32>
    %c0_11 = arith.constant 0 : index
    %c0_12 = arith.constant 0 : index
    %10 = vector.load %arg6[%c0_11, %c0_12] : memref<32x64xf32, #tpu.memory_space<vmem>>, vector<32x64xf32>
    %cst_13 = arith.constant dense<0.000000e+00> : vector<16x64xf32>
    %11 = tpu.matmul %9, %10, %cst_13 {dimension_numbers = #tpu.dot_dimension_numbers<[1], [0], [0], [1], [0, 0, 1, 1], [], []>} : vector<16x32xf32>, vector<32x64xf32>, vector<16x64xf32> -> vector<16x64xf32>
    %c0_14 = arith.constant 0 : index
    %c0_15 = arith.constant 0 : index
    %12 = vector.load %arg7[%c0_14, %c0_15] : memref<1x64xf32, #tpu.memory_space<vmem>>, vector<1x64xf32>
    %13 = vector.broadcast %12 : vector<1x64xf32> to vector<16x64xf32>
    %14 = arith.addf %11, %13 : vector<16x64xf32>
    %15 = vector.shape_cast %14 : vector<16x64xf32> to vector<2x8x64xf32>
    %16 = vector.extract_strided_slice %15 {offsets = [0, 0, 0], sizes = [2, 8, 32], strides = [1, 1, 1]} : vector<2x8x64xf32> to vector<2x8x32xf32>
    %17 = vector.extract_strided_slice %15 {offsets = [0, 0, 32], sizes = [2, 8, 32], strides = [1, 1, 1]} : vector<2x8x64xf32> to vector<2x8x32xf32>
    %18 = vector.shape_cast %5 : vector<2x32xf32> to vector<2x1x32xf32>
    %19 = vector.broadcast %18 : vector<2x1x32xf32> to vector<2x8x32xf32>
    %20 = arith.mulf %19, %16 : vector<2x8x32xf32>
    %cst_16 = arith.constant dense<0.000000e+00> : vector<2x8xf32>
    %21 = vector.multi_reduction <add>, %20, %cst_16 [2] : vector<2x8x32xf32> to vector<2x8xf32>
    %cst_17 = arith.constant 0.176776692 : f32
    %22 = vector.broadcast %cst_17 : f32 to vector<2x8xf32>
    %23 = arith.mulf %21, %22 : vector<2x8xf32>
    %cst_18 = arith.constant dense<0xFF800000> : vector<2xf32>
    %24 = vector.multi_reduction <maximumf>, %23, %cst_18 [1] : vector<2x8xf32> to vector<2xf32>
    %25 = vector.shape_cast %24 : vector<2xf32> to vector<2x1xf32>
    %26 = vector.broadcast %25 : vector<2x1xf32> to vector<2x8xf32>
    %27 = arith.subf %23, %26 : vector<2x8xf32>
    %28 = math.exp %27 : vector<2x8xf32>
    %cst_19 = arith.constant dense<0.000000e+00> : vector<2xf32>
    %29 = vector.multi_reduction <add>, %28, %cst_19 [1] : vector<2x8xf32> to vector<2xf32>
    %30 = vector.shape_cast %29 : vector<2xf32> to vector<2x1xf32>
    %31 = tpu.reciprocal %30 {approx = true} : vector<2x1xf32> -> vector<2x1xf32>
    %32 = arith.mulf %30, %31 : vector<2x1xf32>
    %cst_20 = arith.constant 2.000000e+00 : f32
    %33 = vector.broadcast %cst_20 : f32 to vector<2x1xf32>
    %34 = arith.subf %33, %32 : vector<2x1xf32>
    %35 = arith.mulf %31, %34 : vector<2x1xf32>
    %36 = vector.broadcast %35 : vector<2x1xf32> to vector<2x8xf32>
    %37 = arith.mulf %28, %36 : vector<2x8xf32>
    %38 = vector.shape_cast %37 : vector<2x8xf32> to vector<2x8x1xf32>
    %39 = vector.broadcast %38 : vector<2x8x1xf32> to vector<2x8x32xf32>
    %40 = arith.mulf %39, %17 : vector<2x8x32xf32>
    %cst_21 = arith.constant dense<0.000000e+00> : vector<2x32xf32>
    %41 = vector.multi_reduction <add>, %40, %cst_21 [1] : vector<2x8x32xf32> to vector<2x32xf32>
    %42 = vector.shape_cast %41 : vector<2x32xf32> to vector<2x1x32xf32>
    %43 = vector.shape_cast %42 : vector<2x1x32xf32> to vector<2x1x32xf32>
    %44 = vector.broadcast %43 : vector<2x1x32xf32> to vector<2x8x32xf32>
    %45 = vector.shape_cast %44 : vector<2x8x32xf32> to vector<2x256xf32>
    %c0_22 = arith.constant 0 : index
    %c0_23 = arith.constant 0 : index
    %46 = vector.load %arg8[%c0_22, %c0_23] : memref<2x256xf32, #tpu.memory_space<vmem>>, vector<2x256xf32>
    tpu.vector_store %arg8[%c0_22, %c0_23], %45 {strides = array<i32>} : memref<2x256xf32, #tpu.memory_space<vmem>>, vector<2x256xf32>,
    return
  }
  func.func @transform_0(%arg0: i32) -> (i32, i32) {
    %c0_i32 = arith.constant 0 : i32
    %c0_i32_0 = arith.constant 0 : i32
    return %arg0, %c0_i32 : i32, i32
  }
  func.func @transform_1(%arg0: i32) -> (i32, i32, i32) {
    %c0_i32 = arith.constant 0 : i32
    %c0_i32_0 = arith.constant 0 : i32
    %c0_i32_1 = arith.constant 0 : i32
    return %arg0, %c0_i32, %c0_i32_0 : i32, i32, i32
  }
  func.func @transform_2(%arg0: i32) -> (i32, i32, i32) {
    %c0_i32 = arith.constant 0 : i32
    %c0_i32_0 = arith.constant 0 : i32
    %c0_i32_1 = arith.constant 0 : i32
    return %arg0, %c0_i32, %c0_i32_0 : i32, i32, i32
  }
  func.func @transform_3(%arg0: i32) -> (i32, i32) {
    %c0_i32 = arith.constant 0 : i32
    %c0_i32_0 = arith.constant 0 : i32
    %c0_i32_1 = arith.constant 0 : i32
    return %c0_i32, %c0_i32_0 : i32, i32
  }
  func.func @transform_4(%arg0: i32) -> (i32, i32) {
    %c0_i32 = arith.constant 0 : i32
    %c0_i32_0 = arith.constant 0 : i32
    %c0_i32_1 = arith.constant 0 : i32
    return %c0_i32, %c0_i32_0 : i32, i32
  }
  func.func @transform_5(%arg0: i32) -> (i32, i32) {
    %c0_i32 = arith.constant 0 : i32
    %c0_i32_0 = arith.constant 0 : i32
    %c0_i32_1 = arith.constant 0 : i32
    return %c0_i32, %c0_i32_0 : i32, i32
  }
  func.func @transform_6(%arg0: i32) -> (i32, i32) {
    %c0_i32 = arith.constant 0 : i32
    %c0_i32_0 = arith.constant 0 : i32
    %c0_i32_1 = arith.constant 0 : i32
    return %c0_i32, %c0_i32_0 : i32, i32
  }
  func.func @transform_7(%arg0: i32) -> (i32, i32) {
    %c0_i32 = arith.constant 0 : i32
    %c0_i32_0 = arith.constant 0 : i32
    return %arg0, %c0_i32 : i32, i32
  }
}

</mosaic_0001>

<bundles_post_ra>
// kernel: tpu_custom_call.1
= control target key start
LH: loop header
LB: loop body
LE: loop exit
PB: predicated region body
PF: predicated region fallthrough
CT: control target
= control target key end

     0   :  { %12 = vsyncpa [#allocation3], 0  ;;  %s693_s0 = inlined_call_operand.hbm [shape: f32[2,32], index: 0, kind: input, shape index: {}]   ;;  %s694_s1 = inlined_call_operand.hbm [shape: f32[2,8,16], index: 1, kind: input, shape index: {}]   ;;  %s695_s2 = inlined_call_operand.hbm [shape: f32[2,8,16], index: 2, kind: input, shape index: {}]   ;;  %s696_s3 = inlined_call_operand.hbm [shape: f32[32,32], index: 3, kind: input, shape index: {}]   ;;  %s697_s4 = inlined_call_operand.vmem [shape: f32[1,32], index: 4, kind: input, shape index: {}]   ;;  %s698_s5 = inlined_call_operand.hbm [shape: f32[32,64], index: 5, kind: input, shape index: {}]   ;;  %s699_s6 = inlined_call_operand.vmem [shape: f32[1,64], index: 6, kind: input, shape index: {}]   ;;  %s700_s7 = inlined_call_operand.hbm [shape: f32[2,256], index: 7, kind: output, shape index: {}]  }
   0x1   :  { %13 = vsyncpa [#allocation6], 0 }
   0x2   :  { %14 = vsyncpa [#allocation9], 0  ;;  %s31_s26 = sshll.u32 %s694_s1, 4  ;;  %s32_s26 = int_to_ptr.hbm [resolvable:$true] %s31_s26 }
   0x3   :  { %15 = vsyncpa [#allocation4], 0  ;;  %s585_s27 = smov [#allocation5]   ;;  %s57_s8 = sshll.u32 %s696_s3, 4  ;;  %s58_s8 = int_to_ptr.hbm [resolvable:$true] %s57_s8 }
   0x4   :  { %s33_s28 = sshll.u32 %s585_s27, 4  ;;  %s586_s9 = smov 128   ;;  %s34_s28 = int_to_ptr.vmem [resolvable:$true] %s33_s28 }
   0x5   :  { %s587_s10 = smov 8   ;;  %s588_s11 = smov [#allocation8]  }
   0x6   :  { %39 = dma.hbm_to_vmem [thread:$0]  %s32_s26, 256, %s34_s28, [#allocation6], %s586_s9, %s586_s9, %s587_s10  }
   0x7   :  { %s59_s12 = sshll.u32 %s588_s11, 4  ;;  %s21_s15 = sshll.u32 %s693_s0, 4  ;;  %s60_s12 = int_to_ptr.vmem [resolvable:$true] %s59_s12  ;;  %s22_s15 = int_to_ptr.hbm [resolvable:$true] %s21_s15 }
   0x8   :  { %65 = dma.hbm_to_vmem [thread:$0]  %s58_s8, 512, %s60_s12, [#allocation9], %s586_s9, %s586_s9, %s587_s10  }
   0x9   :  { %s44_s17 = sshll.u32 %s695_s2, 4  ;;  %s589_s18 = smov [#allocation2]   ;;  %s45_s17 = int_to_ptr.hbm [resolvable:$true] %s44_s17 }
   0xa   :  { %s23_s19 = sshll.u32 %s589_s18, 4  ;;  %s590_s3 = smov [#allocation7]   ;;  %s24_s19 = int_to_ptr.vmem [resolvable:$true] %s23_s19 }
   0xb   :  { %26 = dma.hbm_to_vmem [thread:$0]  %s22_s15, 32, %s24_s19, [#allocation3]  }
   0xc   :  { %s46_s20 = sshll.u32 %s590_s3, 4  ;;  %s72_s23 = sshll.u32 %s698_s5, 4  ;;  %s47_s20 = int_to_ptr.vmem [resolvable:$true] %s46_s20  ;;  %s73_s23 = int_to_ptr.hbm [resolvable:$true] %s72_s23 }
   0xd   :  { %52 = dma.hbm_to_vmem [thread:$0]  %s45_s17, 256, %s47_s20, [#allocation6], %s586_s9, %s586_s9, %s587_s10  }
   0xe   :  { %s591_s0 = smov [#allocation10]  }
   0xf   :  { %s74_s24 = sshll.u32 %s591_s0, 4  ;;  %s75_s24 = int_to_ptr.vmem [resolvable:$true] %s74_s24 }
  0x10   :  { %80 = dma.hbm_to_vmem [thread:$0]  %s73_s23, 512, %s75_s24, [#allocation9], %s586_s9, %s586_s9, %s587_s10  }
  0x11   :  { %577 = dma.done.wait [#allocation3], 32  }
  0x12   :  { %578 = vsyncadd [#allocation3], 4294967264 }
  0x13   :  { %579 = dma.done.wait [#allocation6], 512  }
  0x14   :  { %580 = vsyncadd [#allocation6], 4294966784 }
  0x15   :  { %581 = dma.done.wait [#allocation9], 1024  }
  0x16   :  { %582 = vsyncadd [#allocation9], 4294966272  ;;  %v139_v0 = vld [vmem:[#allocation7 + $0x8] sm:$0xff]  ;;  %s592_s2 = smov 16   ;;  %v153_v3 = vld [vmem:[#allocation10 + $0x10] sm:$0xff]  ;;  %vm112_vm0 = vcmask 261120   ;;  %v206_v33 = vlaneseq }
  0x17   :  { %v154_v1 = vld [vmem:[#allocation10 + $0x18] sm:$0xff]  ;;  %144 = vrot.lane.b32.xlu0 %v139_v0, %s592_s2  ;;  %v106_v4 = vld [vmem:[#allocation8 + $0x10] sm:$0xff]  ;;  %v152_v5 = vld [vmem:[#allocation10 + $0x8] sm:$0xff]  ;;  %vm148_vm1 = vcmask 130048   ;;  %vm210_vm2 = vcmask 1041409   ;;  %vm213_vm3 = vcmask 58368  }
  0x18   :  { %403 = vmatpush.msra.mxu2 %v154_v1  ;;  %v107_v2 = vld [vmem:[#allocation8 + $0x18] sm:$0xff]  ;;  %177 = vmatpush.msra.mxu1 %v154_v1  ;;  %v138_v6 = vld [vmem:[#allocation7] sm:$0xff]  ;;  %v105_v7 = vld [vmem:[#allocation8 + $0x8] sm:$0xff]  ;;  %v207_v34 = vand.u32 127, %v206_v33  ;;  %v593_v42 = vmov 0   ;;  %vm266_vm4 = vcmask 523520  }
  0x19   :  { %128 = vmatpush.msra.mxu0 %v107_v2  ;;  %v151_v8 = vld [vmem:[#allocation10] sm:$0xff]  ;;  %v103_v10 = vld [vmem:[#allocation2] sm:$0x3]  ;;  %v137_v11 = vld [vmem:[#allocation5 + $0x8] sm:$0xff]  ;;  %423 = vset.pattern.permute.xlu0 %v593_v42  ;;  %vm290_vm5 = vcmask 1047556   ;;  %s598_s28 = smov 64  }
  0x1a   :  { %404 = vmatpush.msra.mxu2 %v153_v3  ;;  %178 = vmatpush.msra.mxu1 %v153_v3  ;;  %v104_v9 = vld [vmem:[#allocation8] sm:$0xff]  ;;  %v425_v17 = vld [vmem:[%s697_s4] ss:$0 sm:$0xff]  ;;  %s594_s4 = smov 96   ;;  %vm367_vm6 = vcmask 523264   ;;  %vm369_vm7 = vcmask 785408  }
  0x1b   :  { %129 = vmatpush.msra.mxu0 %v106_v4  ;;  %v136_v14 = vld [vmem:[#allocation5] sm:$0xff]  ;;  %v426_v21 = vld [vmem:[%s699_s6] ss:$0 sm:$0xff]  ;;  %422 = vset.pattern.permute.xlu2 %v593_v42  ;;  %s597_s6 = smov 32   ;;  %s599_s29 = smov [#allocation11]   ;;  %vm377_vm8 = vcmask 1041408  }
  0x1c   :  { %405 = vmatpush.msra.mxu2 %v152_v5  ;;  %179 = vmatpush.msra.mxu1 %v152_v5  ;;  %s386_s30 = sshll.u32 %s599_s29, 4  ;;  %s388_s10 = sshll.u32 %s700_s7, 4  ;;  %s387_s30 = int_to_ptr.vmem [resolvable:$true] %s386_s30  ;;  %s389_s10 = int_to_ptr.hbm [resolvable:$true] %s388_s10 }
  0x1d   :  { %130 = vmatpush.msra.mxu0 %v105_v7  ;;  %424 = vset.pattern.permute.xlu1 %v593_v42 }
  0x1e   :  { %406 = vmatpush.msra.mxu2 %v151_v8  ;;  %180 = vmatpush.msra.mxu1 %v151_v8 }
  0x1f   :  { %142 = vrot.lane.b32.xlu0 %v138_v6, %s592_s2  ;;  %131 = vmatpush.msra.mxu0 %v104_v9 }
  0x20   :  { %400 = vmatmul.msk.f32.vlgmr.msra.gmra.mxu0 %vm112_vm0, %v103_v10 }
  0x89   :  { %v145_v12 = vpop.permute.xlu0 %144 }
  0x8a   :  { %v150_v13 = vsel %vm148_vm1, %v137_v11, %v145_v12 }
  0x8b   :  { %402 = vmatmul.msk.f32.vlgmr.msra.gmra.mxu2 %vm112_vm0, %v150_v13 }
  0x91   :  { %v143_v15 = vpop.permute.xlu0 %142 }
  0x92   :  { %v149_v16 = vsel %vm148_vm1, %v136_v14, %v143_v15 }
  0x93   :  { %401 = vmatmul.msk.f32.vlgmr.msra.gmra.mxu1 %vm112_vm0, %v149_v16 }
  0x9d   :  { %v133_v18 = vpop.f32.mrf.mxu0 }
  0x9e   :  { %v134_v19 = vadd.f32 %v425_v17, %v133_v18 }
  0xa0   :  { %v190_v20 = vperm.slane %v134_v19, 0  ;;  %v189_v23 = vrot.slane %v134_v19, 1 }
  0xa2   :  { %v191_v27 = vperm.slane %v189_v23, 0 }
 0x10e   :  { %v185_v25 = vpop.f32.mrf.mxu2 }
 0x10f   :  { %v186_v28 = vadd.f32 %v426_v21, %v185_v25 }
 0x110   :  { %v182_v22 = vpop.f32.mrf.mxu1 }
 0x111   :  { %v664_v24 = vadd.f32 %v426_v21, %v182_v22  ;;  %v195_v30 = vmul.f32 %v191_v27, %v186_v28  ;;  %v595_v21 = vmov 1983009808  }
 0x112   :  { %v293_v22 = vunpack.c.l.s4 %v595_v21 }
 0x113   :  { %v194_v26 = vmul.f32 %v190_v20, %v664_v24  ;;  %v199_v31 = vsel %vm112_vm0, %v195_v30, 0.0 }
 0x115   :  { %v196_v29 = vsel %vm112_vm0, %v194_v26, 0.0  ;;  %v596_v26 = vmov 1934713408  }
 0x116   :  { %197 = vadd.xlane.f32.xlu1 %v196_v29  ;;  %v315_v27 = vunpack.c.l.s4 %v596_v26 }
 0x11e   :  { %200 = vadd.xlane.f32.xlu1 %v199_v31 }
 0x189   :  { %v198_v32 = vpop.xlane.xlu1 %197 }
 0x18a   :  { %v202_v35 = vmul.f32 0.17677669, %v198_v32  ;;  %v316_v32 = vunpack.c.0.s8 %v315_v27 }
 0x18c   :  { %v208_v38 = vperm.slane %v202_v35, %v207_v34 }
 0x191   :  { %v201_v36 = vpop.xlane.xlu1 %200 }
 0x192   :  { %v203_v37 = vmul.f32 0.17677669, %v201_v36 }
 0x194   :  { %v209_v39 = vperm.slane %v203_v37, %v207_v34 }
 0x196   :  { %v211_v40 = vsel %vm210_vm2, %v209_v39, %v208_v38 }
 0x197   :  { %v214_v41 = vsel %vm213_vm3, %v211_v40, -inf }
 0x198   :  { %215 = vmax.xlane.f32.xlu2 %v214_v41 }
 0x20b   :  { %v216_v43 = vpop.xlane.xlu2 %215 }
 0x20c   :  { %v218_v44 = vperm.slane %v216_v43, 0  ;;  %v219_v45 = vperm.slane %v216_v43, 1 }
 0x20e   :  { %v222_v46 = vsub.f32 %v202_v35, %v218_v44  ;;  %v223_v47 = vsub.f32 %v203_v37, %v219_v45 }
 0x210   :  { %v224_v48 = vmul.f32 1.442695, %v222_v46  ;;  %v226_v49 = vmul.f32 1.442695, %v223_v47 }
 0x212   :  { %427 = vpow2.f32 %v224_v48 }
 0x213   :  { %429 = vpow2.f32 %v226_v49 }
 0x218   :  { %v428_v50 = vpop.eup %427 }
 0x219   :  { %v430_v51 = vpop.eup %429  ;;  %231 = vperm.xlu2 %422, %v428_v50  }
 0x21a   :  { %234 = vperm.xlu0 %423, %v430_v51  }
 0x273   :  { %v232_v52 = vpop.permute.xlu2 %231 }
 0x274   :  { %v236_v54 = vperm.slane %v232_v52, %v207_v34 }
 0x28c   :  { %v235_v53 = vpop.permute.xlu0 %234 }
 0x28d   :  { %v237_v55 = vperm.slane %v235_v53, %v207_v34 }
 0x28f   :  { %v238_v56 = vsel %vm210_vm2, %v237_v55, %v236_v54 }
 0x290   :  { %v240_v57 = vsel %vm213_vm3, %v238_v56, 0.0 }
 0x291   :  { %241 = vadd.xlane.f32.xlu1 %v240_v57 }
 0x304   :  { %v242_v58 = vpop.xlane.xlu1 %241 }
 0x305   :  { %431 = vrcp.f32 %v242_v58 }
 0x30b   :  { %v432_v59 = vpop.eup %431 }
 0x30c   :  { %v244_v60 = vmul.f32 %v432_v59, %v242_v58 }
 0x30e   :  { %v245_v61 = vsub.f32 2.0, %v244_v60 }
 0x310   :  { %v246_v62 = vmul.f32 %v432_v59, %v245_v61 }
 0x312   :  { %v249_v63 = vperm.slane %v246_v62, 1  ;;  %v248_v0 = vperm.slane %v246_v62, 0 }
 0x314   :  { %v253_v1 = vmul.f32 %v430_v51, %v249_v63  ;;  %v252_v2 = vmul.f32 %v428_v50, %v248_v0 }
 0x316   :  { %261 = vperm.xlu1 %424, %v253_v1   ;;  %256 = vperm.xlu0 %423, %v252_v2  }
 0x388   :  { %v262_v3 = vpop.permute.xlu1 %261  ;;  %v257_v4 = vpop.permute.xlu0 %256 }
 0x389   :  { %v265_v5 = vmul.f32 %v262_v3, %v186_v28  ;;  %v264_v6 = vmul.f32 %v257_v4, %v664_v24  ;;  %v294_v24 = vunpack.c.0.s8 %v293_v22 }
 0x38b   :  { %v274_v7 = vsel %vm266_vm4, %v265_v5, 0.0  ;;  %v267_v8 = vsel %vm266_vm4, %v264_v6, 0.0 }
 0x38c   :  { %v275_v9 = vrot.slane %v274_v7, 4  ;;  %v268_v10 = vrot.slane %v267_v8, 4 }
 0x38e   :  { %v276_v11 = vadd.f32 %v275_v9, %v274_v7  ;;  %v269_v12 = vadd.f32 %v268_v10, %v267_v8 }
 0x390   :  { %v277_v13 = vrot.slane %v276_v11, 2  ;;  %v270_v14 = vrot.slane %v269_v12, 2 }
 0x392   :  { %v278_v15 = vadd.f32 %v277_v13, %v276_v11  ;;  %v271_v16 = vadd.f32 %v270_v14, %v269_v12 }
 0x394   :  { %v279_v17 = vrot.slane %v278_v15, 1  ;;  %v272_v18 = vrot.slane %v271_v16, 1 }
 0x396   :  { %v280_v19 = vadd.f32 %v279_v17, %v278_v15  ;;  %v273_v20 = vadd.f32 %v272_v18, %v271_v16 }
 0x398   :  { %285 = vrot.lane.b32.xlu2 %v280_v19, %s594_s4  ;;  %283 = vrot.lane.b32.xlu0 %v273_v20, %s594_s4 }
 0x3f2   :  { %v286_v23 = vpop.permute.xlu2 %285 }
 0x3f3   :  { %v300_v25 = vrot.slane %v286_v23, 4  ;;  %v305_v29 = vperm.slane %v286_v23, %v294_v24 }
 0x3f5   :  { %v301_v28 = vsel %vm290_vm5, 0.0, %v300_v25  ;;  %v310_v33 = vrot.slane %v305_v29, 4 }
 0x3f6   :  { %v309_v30 = vperm.slane %v301_v28, %v294_v24 }
 0x3f8   :  { %v322_v38 = vrot.slane %v309_v30, 4 }
 0x40a   :  { %v284_v31 = vpop.permute.xlu0 %283 }
 0x40b   :  { %v289_v34 = vrot.slane %v284_v31, 4  ;;  %v295_v35 = vperm.slane %v284_v31, %v294_v24 }
 0x40d   :  { %v291_v36 = vsel %vm290_vm5, 0.0, %v289_v34  ;;  %v311_v37 = vsel %vm290_vm5, %v310_v33, %v295_v35  ;;  %v312_v47 = vrot.slane %v295_v35, 4 }
 0x40e   :  { %v299_v39 = vperm.slane %v291_v36, %v294_v24  ;;  %v317_v40 = vperm.slane %v311_v37, %v316_v32 }
 0x40f   :  { %v313_v52 = vsel %vm290_vm5, %v305_v29, %v312_v47 }
 0x410   :  { %v324_v41 = vrot.slane %v299_v39, 4  ;;  %v334_v42 = vrot.slane %v317_v40, 4  ;;  %v323_v43 = vsel %vm290_vm5, %v322_v38, %v299_v39  ;;  %v321_v54 = vperm.slane %v313_v52, %v316_v32 }
 0x411   :  { %v329_v46 = vperm.slane %v323_v43, %v316_v32 }
 0x412   :  { %v335_v44 = vsel %vm290_vm5, 0.0, %v334_v42  ;;  %v325_v45 = vsel %vm290_vm5, %v309_v30, %v324_v41  ;;  %v336_v55 = vrot.slane %v321_v54, 4 }
 0x413   :  { %343 = vrot.lane.b32.xlu2 %v335_v44, %s597_s6  ;;  %v333_v48 = vperm.slane %v325_v45, %v316_v32  ;;  %v338_v50 = vrot.slane %v329_v46, 4 }
 0x414   :  { %v337_v56 = vsel %vm290_vm5, 0.0, %v336_v55 }
 0x415   :  { %359 = vrot.lane.b32.xlu0 %v333_v48, %s598_s28  ;;  %v340_v49 = vrot.slane %v333_v48, 4  ;;  %v339_v53 = vsel %vm290_vm5, 0.0, %v338_v50 }
 0x417   :  { %v341_v51 = vsel %vm290_vm5, 0.0, %v340_v49 }
 0x418   :  { %363 = vrot.lane.b32.xlu1 %v341_v51, %s594_s4 }
 0x41b   :  { %355 = vrot.lane.b32.xlu2 %v339_v53, %s597_s6 }
 0x41d   :  { %347 = vrot.lane.b32.xlu0 %v321_v54, %s598_s28 }
 0x423   :  { %351 = vrot.lane.b32.xlu2 %v337_v56, %s594_s4 }
 0x46d   :  { %v344_v57 = vpop.permute.xlu2 %343 }
 0x46e   :  { %v366_v0 = vsel %vm112_vm0, %v317_v40, %v344_v57 }
 0x475   :  { %v356_v58 = vpop.permute.xlu2 %355 }
 0x476   :  { %v371_v61 = vsel %vm112_vm0, %v329_v46, %v356_v58 }
 0x47d   :  { %v352_v2 = vpop.permute.xlu2 %351 }
 0x487   :  { %v360_v59 = vpop.permute.xlu0 %359 }
 0x488   :  { %v372_v62 = vsel %vm367_vm6, %v371_v61, %v360_v59 }
 0x48a   :  { %v364_v60 = vpop.permute.xlu1 %363 }
 0x48b   :  { %v373_v63 = vsel %vm369_vm7, %v372_v62, %v364_v60 }
 0x48c   :  { %v376_v3 = vrot.slane %v373_v63, 6 }
 0x48f   :  { %v348_v1 = vpop.permute.xlu0 %347 }
 0x490   :  { %v368_v4 = vsel %vm367_vm6, %v366_v0, %v348_v1 }
 0x491   :  { %v370_v5 = vsel %vm369_vm7, %v368_v4, %v352_v2 }
 0x492   :  { %v378_v6 = vsel %vm377_vm8, %v370_v5, %v376_v3 }
 0x493   :  { %380 = vst [vmem:[#allocation11] sm:$0xf] %v378_v6 }
 0x494   :  { %391 = dma.vmem_to_hbm [thread:$0]  %s387_s30, 64, %s389_s10, [#allocation4]  }
 0x495   :  { %583 = dma.done.wait [#allocation4], 64  }
 0x496   :  { %584 = vsyncadd [#allocation4], 4294967232 }
 0x497   :  { %396 = vsyncpa [#allocation3], 1 }
 0x498   :  { %397 = vsyncpa [#allocation6], 1 }
 0x499   :  { %398 = vsyncpa [#allocation9], 1 }
 0x49a   :  { %399 = vsyncpa [#allocation4], 1 }

</bundles_post_ra>
